<compile_context>
chip_gen: v6e
topology: v6e:2x2x1
jax: 0.10.0
libtpu: 0.0.40
codegen_flags: <defaults>
</compile_context>

<pallas_src>
import functools

import jax
import jax.numpy as jnp
from jax.experimental import pallas as pl
from jax.experimental.pallas import tpu as pltpu

NUM_OF_CLASS = 12
IGNORE_INDEX = -100
MAX_TILE_PIX = 32768          # pixels per grid step; 12*32768*4B ~= 1.5 MB f32 tile

# part_colors for num_of_class == 12 (from the reference module).
PART_COLORS_12 = jnp.array(
    [(111, 74, 0), (81, 0, 81), (128, 64, 128), (244, 35, 232),
     (250, 170, 160), (230, 150, 140), (70, 70, 70), (102, 102, 156),
     (190, 153, 153), (180, 165, 180), (150, 120, 90), (250, 170, 30),
     (220, 220, 0), (107, 142, 35), (152, 251, 152), (119, 11, 32),
     (0, 0, 142)], dtype=jnp.uint8)


# ---------------------------------------------------------------------------
# Pallas kernel: masked cross-entropy partial sums (per image, per split).
#   logits tile: (C, R, TL)  classes on the leading axis, pixels dense in
#                            (sublane=R, lane=TL)
#   target tile: (R, TL)     int8 in HBM, upcast in-kernel
#   outputs:     per-(image, split) (1, 1) sum and count, written on the
#                last pixel tile of that split
# ---------------------------------------------------------------------------
def _ce_kernel(logit_ref, tgt_ref, sum_ref, cnt_ref, sum_acc, cnt_acc,
               *, num_class):
    i = pl.program_id(2)                                  # pixel-tile index

    # Reset the pixel-dense accumulators at the start of each (image, split).
    @pl.when(i == 0)
    def _():
        sum_acc[...] = jnp.zeros_like(sum_acc)
        cnt_acc[...] = jnp.zeros_like(cnt_acc)

    x = logit_ref[...].astype(jnp.float32)                # (C, R, TL)
    t = tgt_ref[...].astype(jnp.int32)                    # (R, TL)

    # Numerically stable log-sum-exp over the leading class axis: pure
    # elementwise work over C full-density (R, TL) slabs (no XLU reduce,
    # no work on sublane-padding rows).
    m = jnp.max(x, axis=0)                                # (R, TL)
    lse = m + jnp.log(jnp.sum(jnp.exp(x - m[None]), axis=0))

    # Gather the logit at the target class: unrolled compare/select over C.
    picked = jnp.zeros_like(m)
    for ci in range(num_class):
        picked = picked + jnp.where(t == ci, x[ci], 0.0)

    # Targets are padded with IGNORE_INDEX up to the tiled extent in the
    # wrapper, so this single mask also neutralizes the (undefined) logits
    # of the partial tail tile.
    valid = t != IGNORE_INDEX                             # (R, TL)
    # NOTE: keep jnp.where as a true select; tail-tile logits may be Inf/NaN
    # garbage and must not be folded in via multiply-by-mask.
    per_pix = jnp.where(valid, lse - picked, 0.0)

    # Pixel-dense elementwise accumulation (no cross-lane reduce per step).
    sum_acc[...] += per_pix
    cnt_acc[...] += valid.astype(jnp.float32)

    # Single cross-lane/sublane reduction + (1,1) store per (image, split).
    @pl.when(i == pl.num_programs(2) - 1)
    def _():
        s_row = jnp.sum(sum_acc[...], axis=1, keepdims=True)   # (R, 1)
        c_row = jnp.sum(cnt_acc[...], axis=1, keepdims=True)
        sum_ref[...] = jnp.sum(s_row, axis=0, keepdims=True)   # (1, 1)
        cnt_ref[...] = jnp.sum(c_row, axis=0, keepdims=True)


def cross_entropy_loss_pallas(logit_nchw, target_nhw, *,
                              max_tile_pix=MAX_TILE_PIX):
    """CrossEntropyLoss(ignore_index=-100, reduction='mean') on TPU.

    logit_nchw: (N, C, H, W) float logits (native dtype is streamed as-is)
    target_nhw: (N, H, W)   int class indices (or -100 to ignore)
    """
    n, c, h, w = logit_nchw.shape
    p = h * w

    # Free row-major reshapes only: NCHW -> (N, C, 8, P/8), labels
    # (N, H, W) -> (N, 8, P/8).  Pixels are dense over (sublane, lane);
    # the class axis leads, so class reductions are slab-elementwise.
    r = 8 if p % 8 == 0 else 1          # fallback keeps odd sizes correct
    l = p // r

    logits = logit_nchw.reshape(n, c, r, l)                    # free view
    # int8 targets: 4x less target HBM traffic; -100 and class ids fit int8.
    targets = target_nhw.reshape(n, r, l).astype(jnp.int8)

    lane_cap = max_tile_pix // r                               # mult. of 128
    tile_lane = l if l <= lane_cap else lane_cap
    num_tiles = pl.cdiv(l, tile_lane)

    # Extra 2-way "parallel" pixel split so v7x's two TensorCores stay busy
    # even at N=1 (serial/harmless on single-TC v5e/v6e).  Only split when
    # the tile count divides evenly so no logits block is fully OOB.
    n_splits = 2 if (num_tiles >= 2 and num_tiles % 2 == 0) else 1
    tiles_per_split = num_tiles // n_splits

    # Pad the (cheap, int8) targets to the tiled extent with IGNORE_INDEX so
    # the kernel needs no iota/in-bounds mask and never trusts the contents
    # of out-of-bounds tail-tile reads.  Logits stay unpadded.
    l_pad = num_tiles * tile_lane
    if l_pad > l:
        targets = jnp.pad(targets, ((0, 0), (0, 0), (0, l_pad - l)),
                          constant_values=IGNORE_INDEX)

    kernel = functools.partial(_ce_kernel, num_class=c)

    sums, cnts = pl.pallas_call(
        kernel,
        out_shape=(jax.ShapeDtypeStruct((n * n_splits, 1, 1), jnp.float32),
                   jax.ShapeDtypeStruct((n * n_splits, 1, 1), jnp.float32)),
        grid_spec=pltpu.PrefetchScalarGridSpec(
            num_scalar_prefetch=0,
            grid=(n, n_splits, tiles_per_split),
            in_specs=[
                pl.BlockSpec((pl.Squeezed(), c, r, tile_lane),
                             lambda b, s, i: (b, 0, 0,
                                              s * tiles_per_split + i)),
                pl.BlockSpec((pl.Squeezed(), r, tile_lane),
                             lambda b, s, i: (b, 0,
                                              s * tiles_per_split + i)),
            ],
            out_specs=[
                pl.BlockSpec((pl.Squeezed(), 1, 1),
                             lambda b, s, i: (b * n_splits + s, 0, 0)),
                pl.BlockSpec((pl.Squeezed(), 1, 1),
                             lambda b, s, i: (b * n_splits + s, 0, 0)),
            ],
            scratch_shapes=[
                pltpu.VMEM((r, tile_lane), jnp.float32),   # per-pixel loss acc
                pltpu.VMEM((r, tile_lane), jnp.float32),   # per-pixel valid acc
            ],
        ),
        compiler_params=pltpu.CompilerParams(
            dimension_semantics=("parallel", "parallel", "arbitrary")),
    )(logits, targets)

    loss_sum = jnp.sum(sums)
    loss_cnt = jnp.sum(cnts)
    # NOTE: PyTorch returns NaN when every pixel is ignored; we return 0.
    return loss_sum / jnp.maximum(loss_cnt, 1.0)


# ---------------------------------------------------------------------------
# Plain-JAX glue (matches the PyTorch module's non-kernel code).
# ---------------------------------------------------------------------------
def _nearest_resize_labels(lab_nhw, out_size):
    """F.interpolate(mode='nearest') on an integer label map (N, H, W)."""
    n, h, w = lab_nhw.shape
    ih = (jnp.arange(out_size) * h) // out_size
    iw = (jnp.arange(out_size) * w) // out_size
    return lab_nhw[:, ih][:, :, iw]


def vis_map(segres, num_of_class, is_gt=False):
    """Color visualization of a segmentation map, resized to 256x256.

    segres: (C, H, W) logits when is_gt=False, else (H, W) integer labels.
    Returns uint8 (256, 256, 3).
    """
    # TODO(synk): cv2.INTER_NEAREST half-pixel rounding may differ by one
    # pixel at non-integer scale factors; floor(dst * src/dst) used here.
    if not is_gt:
        parsing = jnp.argmax(segres, axis=0).astype(jnp.int32)      # (H, W)
    else:
        parsing = segres.astype(jnp.int32)                          # (H, W)
    h, w = parsing.shape
    ih = (jnp.arange(256) * h) // 256
    iw = (jnp.arange(256) * w) // 256
    resized = parsing[ih][:, iw]                                    # (256, 256)
    # Classes outside [0, num_of_class) stay black, as in the reference loop.
    in_range = (resized >= 0) & (resized < num_of_class)
    safe = jnp.clip(resized, 0, PART_COLORS_12.shape[0] - 1)
    colors = jnp.take(PART_COLORS_12, safe, axis=0)                 # (256,256,3)
    return jnp.where(in_range[..., None], colors, jnp.uint8(0))


@functools.partial(jax.jit, static_argnames=("num_of_class",))
def parsing_loss_forward(logit, gt_lab, comb_seg, num_of_class=NUM_OF_CLASS):
    """Mirror of Parsing_Loss.forward.

    logit:    (N, C, S, S)  float logits  (NCHW, like PyTorch)
    gt_lab:   (N, Hg, Wg)   integer labels
    comb_seg: (N, C, S, S)  float logits
    """
    s = logit.shape[-1]
    gt_resized = _nearest_resize_labels(gt_lab.astype(jnp.int32), s)  # (N,S,S)
    loss = cross_entropy_loss_pallas(logit, gt_resized)
    vis_fake = vis_map(logit[0], num_of_class, is_gt=False)
    vis_gt = vis_map(gt_resized[0], num_of_class, is_gt=True)
    vis_comb = vis_map(comb_seg[0], num_of_class, is_gt=False)
    return loss, vis_fake, vis_gt, vis_comb


# ---------------------------------------------------------------------------
def _reference_ce(logit, target):
    """Pure-JAX reference for sanity checking the kernel."""
    n, c, h, w = logit.shape
    x = jnp.transpose(logit, (0, 2, 3, 1)).reshape(-1, c).astype(jnp.float32)
    t = target.reshape(-1)
    lse = jax.nn.logsumexp(x, axis=-1)
    picked = x[jnp.arange(x.shape[0]), jnp.clip(t, 0, c - 1)]
    valid = t != IGNORE_INDEX
    per = jnp.where(valid, lse - picked, 0.0)
    return jnp.sum(per) / jnp.maximum(jnp.sum(valid), 1)


if __name__ == "__main__":
    key = jax.random.PRNGKey(0)
    k1, k2, k3, k4, k5, k6 = jax.random.split(key, 6)

    N, C, S = 2, NUM_OF_CLASS, 16     # logits at 16x16
    HG = 32                           # ground-truth labels at 32x32

    logit = jax.random.normal(k1, (N, C, S, S), dtype=jnp.float32)
    gt_lab = jax.random.randint(k2, (N, HG, HG), 0, NUM_OF_CLASS,
                                dtype=jnp.int32)
    comb_seg = jax.random.normal(k3, (N, C, S, S), dtype=jnp.float32)

    loss, vis_fake, vis_gt, vis_comb = parsing_loss_forward(
        logit, gt_lab, comb_seg)
    jax.block_until_ready((loss, vis_fake, vis_gt, vis_comb))

    # Sanity check against a pure-JAX reference.
    gt_resized = _nearest_resize_labels(gt_lab, S)
    ref = _reference_ce(logit, gt_resized)
    assert jnp.allclose(loss, ref, atol=1e-5, rtol=1e-5), (loss, ref)
    assert vis_fake.shape == (256, 256, 3) and vis_fake.dtype == jnp.uint8
    assert vis_gt.shape == (256, 256, 3) and vis_gt.dtype == jnp.uint8
    assert vis_comb.shape == (256, 256, 3) and vis_comb.dtype == jnp.uint8

    # Exercise the multi-tile / 2-way-split / padded-tail / ignore_index path
    # at small size by forcing a tiny pixel tile (1024 px -> 128 lanes).
    N2, S2 = 1, 40                    # 1600 px -> 200 lanes -> 2 tiles + pad
    logit2 = jax.random.normal(k4, (N2, NUM_OF_CLASS, S2, S2),
                               dtype=jnp.float32)
    tgt2 = jax.random.randint(k5, (N2, S2, S2), 0, NUM_OF_CLASS,
                              dtype=jnp.int32)
    ign = jax.random.bernoulli(k6, 0.1, (N2, S2, S2))
    tgt2 = jnp.where(ign, IGNORE_INDEX, tgt2)
    loss2 = cross_entropy_loss_pallas(logit2, tgt2, max_tile_pix=1024)
    jax.block_until_ready(loss2)
    ref2 = _reference_ce(logit2, tgt2)
    assert jnp.allclose(loss2, ref2, atol=1e-4, rtol=1e-5), (loss2, ref2)

    print("KERNEL_OK")
</pallas_src>

<mosaic_0001>
module attributes {stable_mosaic.version = 11 : i64} {
  func.func @_ce_kernel(%arg0: i32, %arg1: i32, %arg2: i32, %arg3: memref<1x12x8x32xf32, #tpu.memory_space<vmem>>, %arg4: memref<1x8x32xi8, #tpu.memory_space<vmem>>, %arg5: memref<1x1x1xf32, #tpu.memory_space<vmem>>, %arg6: memref<1x1x1xf32, #tpu.memory_space<vmem>>, %arg7: memref<8x32xf32, #tpu.memory_space<vmem>>, %arg8: memref<8x32xf32, #tpu.memory_space<vmem>>) attributes {dimension_semantics = [#tpu.dimension_semantics<parallel>, #tpu.dimension_semantics<parallel>, #tpu.dimension_semantics<arbitrary>], iteration_bounds = array<i64: 2, 1, 1>, scalar_prefetch = 0 : i64, scratch_operands = 2 : i64, tpu.core_type = #tpu.core_type<tc>, window_params = [{transform_indices = @transform_0, window_bounds = array<i64: 1, 12, 8, 32>}, {transform_indices = @transform_1, window_bounds = array<i64: 1, 8, 32>}, {transform_indices = @transform_2, window_bounds = array<i64: 1, 1, 1>}, {transform_indices = @transform_3, window_bounds = array<i64: 1, 1, 1>}]} {
    %c0_i32 = arith.constant 0 : i32
    %0 = arith.cmpi eq, %arg2, %c0_i32 : i32
    %1 = arith.extui %0 : i1 to i32
    %c0_i32_0 = arith.constant 0 : i32
    %2 = arith.cmpi ne, %1, %c0_i32_0 : i32
    scf.if %2 {
      %cst_33 = arith.constant 0.000000e+00 : f32
      %117 = vector.broadcast %cst_33 : f32 to vector<8x32xf32>
      %c0_34 = arith.constant 0 : index
      %c0_35 = arith.constant 0 : index
      %118 = vector.load %arg7[%c0_34, %c0_35] : memref<8x32xf32, #tpu.memory_space<vmem>>, vector<8x32xf32>
      tpu.vector_store %arg7[%c0_34, %c0_35], %117 {strides = array<i32>} : memref<8x32xf32, #tpu.memory_space<vmem>>, vector<8x32xf32>,
      %cst_36 = arith.constant 0.000000e+00 : f32
      %119 = vector.broadcast %cst_36 : f32 to vector<8x32xf32>
      %c0_37 = arith.constant 0 : index
      %c0_38 = arith.constant 0 : index
      %120 = vector.load %arg8[%c0_37, %c0_38] : memref<8x32xf32, #tpu.memory_space<vmem>>, vector<8x32xf32>
      tpu.vector_store %arg8[%c0_37, %c0_38], %119 {strides = array<i32>} : memref<8x32xf32, #tpu.memory_space<vmem>>, vector<8x32xf32>,
    } else {
    }
    %c0 = arith.constant 0 : index
    %c0_1 = arith.constant 0 : index
    %c0_2 = arith.constant 0 : index
    %c0_3 = arith.constant 0 : index
    %3 = vector.load %arg3[%c0, %c0_1, %c0_2, %c0_3] : memref<1x12x8x32xf32, #tpu.memory_space<vmem>>, vector<1x12x8x32xf32>
    %4 = vector.shape_cast %3 : vector<1x12x8x32xf32> to vector<12x8x32xf32>
    %c0_4 = arith.constant 0 : index
    %c0_5 = arith.constant 0 : index
    %c0_6 = arith.constant 0 : index
    %5 = vector.load %arg4[%c0_4, %c0_5, %c0_6] : memref<1x8x32xi8, #tpu.memory_space<vmem>>, vector<1x8x32xi8>
    %6 = vector.shape_cast %5 : vector<1x8x32xi8> to vector<8x32xi8>
    %7 = arith.extsi %6 : vector<8x32xi8> to vector<8x32xi32>
    %cst = arith.constant dense<0xFF800000> : vector<8x32xf32>
    %8 = vector.multi_reduction <maximumf>, %4, %cst [0] : vector<12x8x32xf32> to vector<8x32xf32>
    %9 = vector.shape_cast %8 : vector<8x32xf32> to vector<1x8x32xf32>
    %10 = vector.broadcast %9 : vector<1x8x32xf32> to vector<12x8x32xf32>
    %11 = arith.subf %4, %10 : vector<12x8x32xf32>
    %12 = math.exp %11 : vector<12x8x32xf32>
    %cst_7 = arith.constant dense<0.000000e+00> : vector<8x32xf32>
    %13 = vector.multi_reduction <add>, %12, %cst_7 [0] : vector<12x8x32xf32> to vector<8x32xf32>
    %14 = math.log %13 : vector<8x32xf32>
    %15 = arith.addf %8, %14 : vector<8x32xf32>
    %cst_8 = arith.constant 0.000000e+00 : f32
    %16 = vector.broadcast %cst_8 : f32 to vector<8x32xf32>
    %c0_i32_9 = arith.constant 0 : i32
    %17 = vector.broadcast %c0_i32_9 : i32 to vector<8x32xi32>
    %18 = arith.cmpi eq, %7, %17 : vector<8x32xi32>
    %19 = vector.extract_strided_slice %4 {offsets = [0, 0, 0], sizes = [1, 8, 32], strides = [1, 1, 1]} : vector<12x8x32xf32> to vector<1x8x32xf32>
    %20 = vector.shape_cast %19 : vector<1x8x32xf32> to vector<8x32xf32>
    %cst_10 = arith.constant 0.000000e+00 : f32
    %21 = vector.broadcast %cst_10 : f32 to vector<8x32xf32>
    %22 = arith.select %18, %20, %21 : vector<8x32xi1>, vector<8x32xf32>
    %23 = arith.addf %16, %22 : vector<8x32xf32>
    %c1_i32 = arith.constant 1 : i32
    %24 = vector.broadcast %c1_i32 : i32 to vector<8x32xi32>
    %25 = arith.cmpi eq, %7, %24 : vector<8x32xi32>
    %26 = vector.extract_strided_slice %4 {offsets = [1, 0, 0], sizes = [1, 8, 32], strides = [1, 1, 1]} : vector<12x8x32xf32> to vector<1x8x32xf32>
    %27 = vector.shape_cast %26 : vector<1x8x32xf32> to vector<8x32xf32>
    %cst_11 = arith.constant 0.000000e+00 : f32
    %28 = vector.broadcast %cst_11 : f32 to vector<8x32xf32>
    %29 = arith.select %25, %27, %28 : vector<8x32xi1>, vector<8x32xf32>
    %30 = arith.addf %23, %29 : vector<8x32xf32>
    %c2_i32 = arith.constant 2 : i32
    %31 = vector.broadcast %c2_i32 : i32 to vector<8x32xi32>
    %32 = arith.cmpi eq, %7, %31 : vector<8x32xi32>
    %33 = vector.extract_strided_slice %4 {offsets = [2, 0, 0], sizes = [1, 8, 32], strides = [1, 1, 1]} : vector<12x8x32xf32> to vector<1x8x32xf32>
    %34 = vector.shape_cast %33 : vector<1x8x32xf32> to vector<8x32xf32>
    %cst_12 = arith.constant 0.000000e+00 : f32
    %35 = vector.broadcast %cst_12 : f32 to vector<8x32xf32>
    %36 = arith.select %32, %34, %35 : vector<8x32xi1>, vector<8x32xf32>
    %37 = arith.addf %30, %36 : vector<8x32xf32>
    %c3_i32 = arith.constant 3 : i32
    %38 = vector.broadcast %c3_i32 : i32 to vector<8x32xi32>
    %39 = arith.cmpi eq, %7, %38 : vector<8x32xi32>
    %40 = vector.extract_strided_slice %4 {offsets = [3, 0, 0], sizes = [1, 8, 32], strides = [1, 1, 1]} : vector<12x8x32xf32> to vector<1x8x32xf32>
    %41 = vector.shape_cast %40 : vector<1x8x32xf32> to vector<8x32xf32>
    %cst_13 = arith.constant 0.000000e+00 : f32
    %42 = vector.broadcast %cst_13 : f32 to vector<8x32xf32>
    %43 = arith.select %39, %41, %42 : vector<8x32xi1>, vector<8x32xf32>
    %44 = arith.addf %37, %43 : vector<8x32xf32>
    %c4_i32 = arith.constant 4 : i32
    %45 = vector.broadcast %c4_i32 : i32 to vector<8x32xi32>
    %46 = arith.cmpi eq, %7, %45 : vector<8x32xi32>
    %47 = vector.extract_strided_slice %4 {offsets = [4, 0, 0], sizes = [1, 8, 32], strides = [1, 1, 1]} : vector<12x8x32xf32> to vector<1x8x32xf32>
    %48 = vector.shape_cast %47 : vector<1x8x32xf32> to vector<8x32xf32>
    %cst_14 = arith.constant 0.000000e+00 : f32
    %49 = vector.broadcast %cst_14 : f32 to vector<8x32xf32>
    %50 = arith.select %46, %48, %49 : vector<8x32xi1>, vector<8x32xf32>
    %51 = arith.addf %44, %50 : vector<8x32xf32>
    %c5_i32 = arith.constant 5 : i32
    %52 = vector.broadcast %c5_i32 : i32 to vector<8x32xi32>
    %53 = arith.cmpi eq, %7, %52 : vector<8x32xi32>
    %54 = vector.extract_strided_slice %4 {offsets = [5, 0, 0], sizes = [1, 8, 32], strides = [1, 1, 1]} : vector<12x8x32xf32> to vector<1x8x32xf32>
    %55 = vector.shape_cast %54 : vector<1x8x32xf32> to vector<8x32xf32>
    %cst_15 = arith.constant 0.000000e+00 : f32
    %56 = vector.broadcast %cst_15 : f32 to vector<8x32xf32>
    %57 = arith.select %53, %55, %56 : vector<8x32xi1>, vector<8x32xf32>
    %58 = arith.addf %51, %57 : vector<8x32xf32>
    %c6_i32 = arith.constant 6 : i32
    %59 = vector.broadcast %c6_i32 : i32 to vector<8x32xi32>
    %60 = arith.cmpi eq, %7, %59 : vector<8x32xi32>
    %61 = vector.extract_strided_slice %4 {offsets = [6, 0, 0], sizes = [1, 8, 32], strides = [1, 1, 1]} : vector<12x8x32xf32> to vector<1x8x32xf32>
    %62 = vector.shape_cast %61 : vector<1x8x32xf32> to vector<8x32xf32>
    %cst_16 = arith.constant 0.000000e+00 : f32
    %63 = vector.broadcast %cst_16 : f32 to vector<8x32xf32>
    %64 = arith.select %60, %62, %63 : vector<8x32xi1>, vector<8x32xf32>
    %65 = arith.addf %58, %64 : vector<8x32xf32>
    %c7_i32 = arith.constant 7 : i32
    %66 = vector.broadcast %c7_i32 : i32 to vector<8x32xi32>
    %67 = arith.cmpi eq, %7, %66 : vector<8x32xi32>
    %68 = vector.extract_strided_slice %4 {offsets = [7, 0, 0], sizes = [1, 8, 32], strides = [1, 1, 1]} : vector<12x8x32xf32> to vector<1x8x32xf32>
    %69 = vector.shape_cast %68 : vector<1x8x32xf32> to vector<8x32xf32>
    %cst_17 = arith.constant 0.000000e+00 : f32
    %70 = vector.broadcast %cst_17 : f32 to vector<8x32xf32>
    %71 = arith.select %67, %69, %70 : vector<8x32xi1>, vector<8x32xf32>
    %72 = arith.addf %65, %71 : vector<8x32xf32>
    %c8_i32 = arith.constant 8 : i32
    %73 = vector.broadcast %c8_i32 : i32 to vector<8x32xi32>
    %74 = arith.cmpi eq, %7, %73 : vector<8x32xi32>
    %75 = vector.extract_strided_slice %4 {offsets = [8, 0, 0], sizes = [1, 8, 32], strides = [1, 1, 1]} : vector<12x8x32xf32> to vector<1x8x32xf32>
    %76 = vector.shape_cast %75 : vector<1x8x32xf32> to vector<8x32xf32>
    %cst_18 = arith.constant 0.000000e+00 : f32
    %77 = vector.broadcast %cst_18 : f32 to vector<8x32xf32>
    %78 = arith.select %74, %76, %77 : vector<8x32xi1>, vector<8x32xf32>
    %79 = arith.addf %72, %78 : vector<8x32xf32>
    %c9_i32 = arith.constant 9 : i32
    %80 = vector.broadcast %c9_i32 : i32 to vector<8x32xi32>
    %81 = arith.cmpi eq, %7, %80 : vector<8x32xi32>
    %82 = vector.extract_strided_slice %4 {offsets = [9, 0, 0], sizes = [1, 8, 32], strides = [1, 1, 1]} : vector<12x8x32xf32> to vector<1x8x32xf32>
    %83 = vector.shape_cast %82 : vector<1x8x32xf32> to vector<8x32xf32>
    %cst_19 = arith.constant 0.000000e+00 : f32
    %84 = vector.broadcast %cst_19 : f32 to vector<8x32xf32>
    %85 = arith.select %81, %83, %84 : vector<8x32xi1>, vector<8x32xf32>
    %86 = arith.addf %79, %85 : vector<8x32xf32>
    %c10_i32 = arith.constant 10 : i32
    %87 = vector.broadcast %c10_i32 : i32 to vector<8x32xi32>
    %88 = arith.cmpi eq, %7, %87 : vector<8x32xi32>
    %89 = vector.extract_strided_slice %4 {offsets = [10, 0, 0], sizes = [1, 8, 32], strides = [1, 1, 1]} : vector<12x8x32xf32> to vector<1x8x32xf32>
    %90 = vector.shape_cast %89 : vector<1x8x32xf32> to vector<8x32xf32>
    %cst_20 = arith.constant 0.000000e+00 : f32
    %91 = vector.broadcast %cst_20 : f32 to vector<8x32xf32>
    %92 = arith.select %88, %90, %91 : vector<8x32xi1>, vector<8x32xf32>
    %93 = arith.addf %86, %92 : vector<8x32xf32>
    %c11_i32 = arith.constant 11 : i32
    %94 = vector.broadcast %c11_i32 : i32 to vector<8x32xi32>
    %95 = arith.cmpi eq, %7, %94 : vector<8x32xi32>
    %96 = vector.extract_strided_slice %4 {offsets = [11, 0, 0], sizes = [1, 8, 32], strides = [1, 1, 1]} : vector<12x8x32xf32> to vector<1x8x32xf32>
    %97 = vector.shape_cast %96 : vector<1x8x32xf32> to vector<8x32xf32>
    %cst_21 = arith.constant 0.000000e+00 : f32
    %98 = vector.broadcast %cst_21 : f32 to vector<8x32xf32>
    %99 = arith.select %95, %97, %98 : vector<8x32xi1>, vector<8x32xf32>
    %100 = arith.addf %93, %99 : vector<8x32xf32>
    %c-100_i32 = arith.constant -100 : i32
    %101 = vector.broadcast %c-100_i32 : i32 to vector<8x32xi32>
    %102 = arith.cmpi ne, %7, %101 : vector<8x32xi32>
    %103 = arith.subf %15, %100 : vector<8x32xf32>
    %cst_22 = arith.constant 0.000000e+00 : f32
    %104 = vector.broadcast %cst_22 : f32 to vector<8x32xf32>
    %105 = arith.select %102, %103, %104 : vector<8x32xi1>, vector<8x32xf32>
    %c0_23 = arith.constant 0 : index
    %c0_24 = arith.constant 0 : index
    %106 = vector.load %arg7[%c0_23, %c0_24] : memref<8x32xf32, #tpu.memory_space<vmem>>, vector<8x32xf32>
    %107 = arith.addf %106, %105 : vector<8x32xf32>
    %c0_25 = arith.constant 0 : index
    %c0_26 = arith.constant 0 : index
    %108 = vector.load %arg7[%c0_25, %c0_26] : memref<8x32xf32, #tpu.memory_space<vmem>>, vector<8x32xf32>
    tpu.vector_store %arg7[%c0_25, %c0_26], %107 {strides = array<i32>} : memref<8x32xf32, #tpu.memory_space<vmem>>, vector<8x32xf32>,
    %c0_27 = arith.constant 0 : index
    %c0_28 = arith.constant 0 : index
    %109 = vector.load %arg8[%c0_27, %c0_28] : memref<8x32xf32, #tpu.memory_space<vmem>>, vector<8x32xf32>
    %110 = arith.extui %102 : vector<8x32xi1> to vector<8x32xi32>
    %111 = arith.sitofp %110 : vector<8x32xi32> to vector<8x32xf32>
    %112 = arith.addf %109, %111 : vector<8x32xf32>
    %c0_29 = arith.constant 0 : index
    %c0_30 = arith.constant 0 : index
    %113 = vector.load %arg8[%c0_29, %c0_30] : memref<8x32xf32, #tpu.memory_space<vmem>>, vector<8x32xf32>
    tpu.vector_store %arg8[%c0_29, %c0_30], %112 {strides = array<i32>} : memref<8x32xf32, #tpu.memory_space<vmem>>, vector<8x32xf32>,
    %c0_i32_31 = arith.constant 0 : i32
    %114 = arith.cmpi eq, %arg2, %c0_i32_31 : i32
    %115 = arith.extui %114 : i1 to i32
    %c0_i32_32 = arith.constant 0 : i32
    %116 = arith.cmpi ne, %115, %c0_i32_32 : i32
    scf.if %116 {
      %c0_33 = arith.constant 0 : index
      %c0_34 = arith.constant 0 : index
      %117 = vector.load %arg7[%c0_33, %c0_34] : memref<8x32xf32, #tpu.memory_space<vmem>>, vector<8x32xf32>
      %cst_35 = arith.constant dense<0.000000e+00> : vector<8xf32>
      %118 = vector.multi_reduction <add>, %117, %cst_35 [1] : vector<8x32xf32> to vector<8xf32>
      %119 = vector.shape_cast %118 : vector<8xf32> to vector<8x1xf32>
      %c0_36 = arith.constant 0 : index
      %c0_37 = arith.constant 0 : index
      %120 = vector.load %arg8[%c0_36, %c0_37] : memref<8x32xf32, #tpu.memory_space<vmem>>, vector<8x32xf32>
      %cst_38 = arith.constant dense<0.000000e+00> : vector<8xf32>
      %121 = vector.multi_reduction <add>, %120, %cst_38 [1] : vector<8x32xf32> to vector<8xf32>
      %122 = vector.shape_cast %121 : vector<8xf32> to vector<8x1xf32>
      %cst_39 = arith.constant dense<0.000000e+00> : vector<1xf32>
      %123 = vector.multi_reduction <add>, %119, %cst_39 [0] : vector<8x1xf32> to vector<1xf32>
      %124 = vector.shape_cast %123 : vector<1xf32> to vector<1x1xf32>
      %c0_40 = arith.constant 0 : index
      %c0_41 = arith.constant 0 : index
      %c0_42 = arith.constant 0 : index
      %125 = vector.load %arg5[%c0_40, %c0_41, %c0_42] : memref<1x1x1xf32, #tpu.memory_space<vmem>>, vector<1x1x1xf32>
      %126 = vector.shape_cast %125 : vector<1x1x1xf32> to vector<1x1xf32>
      %127 = vector.shape_cast %124 : vector<1x1xf32> to vector<1x1x1xf32>
      tpu.vector_store %arg5[%c0_40, %c0_41, %c0_42], %127 {strides = array<i32>} : memref<1x1x1xf32, #tpu.memory_space<vmem>>, vector<1x1x1xf32>,
      %cst_43 = arith.constant dense<0.000000e+00> : vector<1xf32>
      %128 = vector.multi_reduction <add>, %122, %cst_43 [0] : vector<8x1xf32> to vector<1xf32>
      %129 = vector.shape_cast %128 : vector<1xf32> to vector<1x1xf32>
      %c0_44 = arith.constant 0 : index
      %c0_45 = arith.constant 0 : index
      %c0_46 = arith.constant 0 : index
      %130 = vector.load %arg6[%c0_44, %c0_45, %c0_46] : memref<1x1x1xf32, #tpu.memory_space<vmem>>, vector<1x1x1xf32>
      %131 = vector.shape_cast %130 : vector<1x1x1xf32> to vector<1x1xf32>
      %132 = vector.shape_cast %129 : vector<1x1xf32> to vector<1x1x1xf32>
      tpu.vector_store %arg6[%c0_44, %c0_45, %c0_46], %132 {strides = array<i32>} : memref<1x1x1xf32, #tpu.memory_space<vmem>>, vector<1x1x1xf32>,
    } else {
    }
    return
  }
  func.func @transform_0(%arg0: i32, %arg1: i32, %arg2: i32) -> (i32, i32, i32, i32) {
    %c1_i32 = arith.constant 1 : i32
    %0 = arith.muli %arg1, %c1_i32 : i32
    %1 = arith.addi %0, %arg2 : i32
    %c0_i32 = arith.constant 0 : i32
    %c0_i32_0 = arith.constant 0 : i32
    %c0_i32_1 = arith.constant 0 : i32
    return %arg0, %c0_i32, %c0_i32_0, %1 : i32, i32, i32, i32
  }
  func.func @transform_1(%arg0: i32, %arg1: i32, %arg2: i32) -> (i32, i32, i32) {
    %c1_i32 = arith.constant 1 : i32
    %0 = arith.muli %arg1, %c1_i32 : i32
    %1 = arith.addi %0, %arg2 : i32
    %c0_i32 = arith.constant 0 : i32
    %c0_i32_0 = arith.constant 0 : i32
    return %arg0, %c0_i32, %1 : i32, i32, i32
  }
  func.func @transform_2(%arg0: i32, %arg1: i32, %arg2: i32) -> (i32, i32, i32) {
    %c1_i32 = arith.constant 1 : i32
    %0 = arith.muli %arg0, %c1_i32 : i32
    %1 = arith.addi %0, %arg1 : i32
    %c0_i32 = arith.constant 0 : i32
    %c0_i32_0 = arith.constant 0 : i32
    %c0_i32_1 = arith.constant 0 : i32
    return %1, %c0_i32, %c0_i32_0 : i32, i32, i32
  }
  func.func @transform_3(%arg0: i32, %arg1: i32, %arg2: i32) -> (i32, i32, i32) {
    %c1_i32 = arith.constant 1 : i32
    %0 = arith.muli %arg0, %c1_i32 : i32
    %1 = arith.addi %0, %arg1 : i32
    %c0_i32 = arith.constant 0 : i32
    %c0_i32_0 = arith.constant 0 : i32
    %c0_i32_1 = arith.constant 0 : i32
    return %1, %c0_i32, %c0_i32_0 : i32, i32, i32
  }
}

</mosaic_0001>

<bundles_post_ra>
// kernel: parsing_loss_forward.1
= control target key start
LH: loop header
LB: loop body
LE: loop exit
PB: predicated region body
PF: predicated region fallthrough
CT: control target
= control target key end

     0   :  { %s656_s12 = smov 0   ;;  %s658_s13 = smov 0   ;;  %s828_s0 = inlined_call_operand.vmem [shape: f32[2,12,8,32], index: 0, kind: input, shape index: {}]   ;;  %s829_s1 = inlined_call_operand.vmem [shape: s8[2,8,32], index: 1, kind: input, shape index: {}]   ;;  %s830_s2 = inlined_call_operand.vmem [shape: f32[2,1,1], index: 2, kind: output, shape index: {0}]   ;;  %s831_s3 = inlined_call_operand.vmem [shape: f32[2,1,1], index: 3, kind: output, shape index: {1}]  }
   0x1   :  { %s660_s14 = smov 0  }
   0x2 LB: > { %s33_s15 = sadd.s32 1, %s629_s13  ;;  %p553_p0 = scmp.ge.s32.totalorder %s633_s14, 1  ;;  %s633_s14 = sphi %s660_s14, %s14_s14   ;;  %s629_s13 = sphi %s658_s13, %s833_s13   ;;  %s625_s12 = sphi %s656_s12, %s832_s12  }
   0x3   : > { %p35_p1 = scmp.ge.s32.totalorder %s33_s15, 2  ;;  %p190_p2 = scmp.lt.s32.totalorder %s633_s14, 3 }
   0x5   : > { %s835_s15 = smov (%p35_p1, %s33_s15), 0  ;;  %p191_p3 = pnand %p553_p0, %p190_p2 }
   0x6   : > { %p230_p4 = scmp.lt.s32.totalorder (!%p191_p3), %s625_s12, 1 }
   0x7   : > { %194 = sbr.rel (%p191_p3) target bundleno = 257 (0x101), region = 28 }
   0xc   : > { %vm262_vm0 = vcmask 261120   ;;  %v635_v0 = vmov 0.0   ;;  %s837_s12 = smov (!%p230_p4, %s625_s12), 1  ;;  %vm429_vm14 = vcmask 0  }
   0xd   : > { %263 = vst.msk [vmem:[#allocation2] sm:$0xff] %vm262_vm0, %v635_v0  ;;  %264 = vst.msk [vmem:[#allocation3] sm:$0xff] %vm262_vm0, %v635_v0  ;;  %s559_s16 = smul.u32 96, %s837_s12  ;;  %s555_s20 = sshll.u32 %s837_s12, 1 }
   0xe   : > { %s246_s23 = scalar_lea.vmem %s829_s1, %s555_s20  ;;  %s251_s26 = scalar_lea.vmem %s830_s2, %s837_s12 }
   0xf   : > { %s237_s19 = scalar_lea.vmem %s828_s0, %s559_s16  ;;  %v277_v41 = vld [vmem:[%s246_s23] sm:$0x3]  ;;  %s256_s29 = scalar_lea.vmem %s831_s3, %s837_s12 }
  0x10   : > { %v684_v1 = vld [vmem:[%s237_s19] sm:$0xff]  ;;  %v686_v2 = vld [vmem:[%s237_s19 + $0x8] sm:$0xff]  ;;  %v688_v3 = vld [vmem:[%s237_s19 + $0x10] sm:$0xff]  ;;  %v752_v48 = vunpack.c.0.s8 %v277_v41 }
  0x11   : > { %v690_v4 = vld [vmem:[%s237_s19 + $0x18] sm:$0xff]  ;;  %v692_v5 = vld [vmem:[%s237_s19 + $0x20] sm:$0xff]  ;;  %v694_v6 = vld [vmem:[%s237_s19 + $0x28] sm:$0xff]  ;;  %v280_v7 = vsel %vm262_vm0, %v684_v1, -inf  ;;  %v281_v8 = vsel %vm262_vm0, %v686_v2, -inf  ;;  %v282_v9 = vsel %vm262_vm0, %v688_v3, -inf }
  0x12   : > { %v702_v10 = vld [vmem:[%s237_s19 + $0x30] sm:$0xff]  ;;  %v704_v11 = vld [vmem:[%s237_s19 + $0x38] sm:$0xff]  ;;  %v706_v12 = vld [vmem:[%s237_s19 + $0x40] sm:$0xff]  ;;  %v283_v13 = vsel %vm262_vm0, %v690_v4, -inf  ;;  %v284_v14 = vsel %vm262_vm0, %v692_v5, -inf  ;;  %v286_v15 = vsel %vm262_vm0, %v694_v6, -inf }
  0x13   : > { %v714_v16 = vld [vmem:[%s237_s19 + $0x48] sm:$0xff]  ;;  %v716_v17 = vld [vmem:[%s237_s19 + $0x50] sm:$0xff]  ;;  %v718_v18 = vld [vmem:[%s237_s19 + $0x58] sm:$0xff]  ;;  %v285_v19 = vmax.f32 %v280_v7, %v284_v14  ;;  %v287_v20 = vmax.f32 %v281_v8, %v286_v15  ;;  %v288_v21 = vsel %vm262_vm0, %v702_v10, -inf  ;;  %v290_v22 = vsel %vm262_vm0, %v704_v11, -inf }
  0x14   : > { %v289_v23 = vmax.f32 %v282_v9, %v288_v21  ;;  %v291_v24 = vmax.f32 %v283_v13, %v290_v22  ;;  %v292_v25 = vsel %vm262_vm0, %v706_v12, -inf  ;;  %v294_v26 = vsel %vm262_vm0, %v714_v16, -inf  ;;  %v407_v54 = vld [vmem:[#allocation3] sm:$0xff] }
  0x15   : > { %v293_v27 = vmax.f32 %v285_v19, %v292_v25  ;;  %v295_v28 = vmax.f32 %v287_v20, %v294_v26  ;;  %v296_v29 = vsel %vm262_vm0, %v716_v17, -inf  ;;  %v298_v30 = vsel %vm262_vm0, %v718_v18, -inf }
  0x16   : > { %v297_v31 = vmax.f32 %v289_v23, %v296_v29  ;;  %v299_v32 = vmax.f32 %v291_v24, %v298_v30  ;;  %vm365_vm1 = vcmp.eq.s32.totalorder %v752_v48, 0  ;;  %vm401_vm2 = vcmp.ne.s32.totalorder %v752_v48, 4294967196 }
  0x17   : > { %v300_v33 = vmax.f32 %v293_v27, %v295_v28  ;;  %vm368_vm3 = vcmp.eq.s32.totalorder %v752_v48, 1  ;;  %v556_v57 = vsel %vm401_vm2, 1.0, %v635_v0  ;;  %v366_v61 = vsel %vm365_vm1, %v684_v1, 0.0 }
  0x18   : > { %v301_v34 = vmax.f32 %v297_v31, %v299_v32  ;;  %v410_v60 = vadd.f32 %v556_v57, %v407_v54  ;;  %v369_v7 = vsel %vm368_vm3, %v686_v2, 0.0  ;;  %vm371_vm4 = vcmp.eq.s32.totalorder %v752_v48, 2 }
  0x19   : > { %v370_v8 = vadd.f32 %v369_v7, %v366_v61  ;;  %v372_v14 = vsel %vm371_vm4, %v688_v3, 0.0  ;;  %vm374_vm5 = vcmp.eq.s32.totalorder %v752_v48, 3  ;;  %vm377_vm6 = vcmp.eq.s32.totalorder %v752_v48, 4 }
  0x1a   : > { %v733_v35 = vmax.f32 %v300_v33, %v301_v34  ;;  %411 = vst.msk [vmem:[#allocation3] sm:$0xff] %vm262_vm0, %v410_v60  ;;  %v378_v33 = vsel %vm377_vm6, %v692_v5, 0.0  ;;  %vm380_vm7 = vcmp.eq.s32.totalorder %v752_v48, 5  ;;  %vm383_vm8 = vcmp.eq.s32.totalorder %v752_v48, 6 }
  0x1b   : > { %v373_v23 = vadd.f32 %v372_v14, %v370_v8  ;;  %v381_v41 = vsel %vm380_vm7, %v694_v6, 0.0  ;;  %vm386_vm9 = vcmp.eq.s32.totalorder %v752_v48, 7  ;;  %vm389_vm10 = vcmp.eq.s32.totalorder %v752_v48, 8 }
  0x1c   : > { %v303_v36 = vsub.f32 %v684_v1, %v733_v35  ;;  %v304_v37 = vsub.f32 %v686_v2, %v733_v35  ;;  %v305_v38 = vsub.f32 %v688_v3, %v733_v35  ;;  %v306_v39 = vsub.f32 %v690_v4, %v733_v35 }
  0x1d   : > { %v307_v40 = vsub.f32 %v692_v5, %v733_v35  ;;  %v308_v42 = vsub.f32 %v694_v6, %v733_v35  ;;  %v309_v46 = vsub.f32 %v702_v10, %v733_v35  ;;  %v310_v50 = vsub.f32 %v704_v11, %v733_v35 }
  0x1e   : > { %v315_v43 = vmul.f32 1.442695, %v303_v36  ;;  %v317_v44 = vmul.f32 1.442695, %v304_v37  ;;  %v319_v45 = vmul.f32 1.442695, %v305_v38  ;;  %v311_v52 = vsub.f32 %v706_v12, %v733_v35 }
  0x1f   : > { %v321_v47 = vmul.f32 1.442695, %v306_v39  ;;  %v323_v49 = vmul.f32 1.442695, %v307_v40  ;;  %v325_v51 = vmul.f32 1.442695, %v308_v42  ;;  %v312_v55 = vsub.f32 %v714_v16, %v733_v35 }
  0x20   : > { %585 = vpow2.f32 %v315_v43  ;;  %v327_v53 = vmul.f32 1.442695, %v309_v46  ;;  %v329_v56 = vmul.f32 1.442695, %v310_v50  ;;  %v313_v58 = vsub.f32 %v716_v17, %v733_v35 }
  0x21   : > { %587 = vpow2.f32 %v317_v44  ;;  %v331_v59 = vmul.f32 1.442695, %v311_v52  ;;  %v314_v62 = vsub.f32 %v718_v18, %v733_v35  ;;  %v333_v63 = vmul.f32 1.442695, %v312_v55 }
  0x22   : > { %589 = vpow2.f32 %v319_v45  ;;  %v335_v0 = vmul.f32 1.442695, %v313_v58  ;;  %v375_v3 = vsel %vm374_vm5, %v690_v4, 0.0  ;;  %v387_v55 = vsel %vm386_vm9, %v704_v11, 0.0 }
  0x23   : > { %591 = vpow2.f32 %v321_v47  ;;  %v337_v13 = vmul.f32 1.442695, %v314_v62  ;;  %v376_v31 = vadd.f32 %v375_v3, %v373_v23  ;;  %vm392_vm11 = vcmp.eq.s32.totalorder %v752_v48, 9 }
  0x24   : > { %593 = vpow2.f32 %v323_v49  ;;  %v384_v49 = vsel %vm383_vm8, %v702_v10, 0.0  ;;  %v393_v60 = vsel %vm392_vm11, %v714_v16, 0.0  ;;  %vm395_vm12 = vcmp.eq.s32.totalorder %v752_v48, 10 }
  0x25   : > { %595 = vpow2.f32 %v325_v51  ;;  %v379_v39 = vadd.f32 %v378_v33, %v376_v31  ;;  %v396_v62 = vsel %vm395_vm12, %v716_v17, 0.0  ;;  %vm398_vm13 = vcmp.eq.s32.totalorder %v752_v48, 11  ;;  %v419_v17 = vld [vmem:[#allocation3] sm:$0xff] }
  0x26   : > { %597 = vpow2.f32 %v327_v53 }
  0x27   : > { %599 = vpow2.f32 %v329_v56  ;;  %v382_v46 = vadd.f32 %v381_v41, %v379_v39 }
  0x28   : > { %601 = vpow2.f32 %v331_v59  ;;  %v390_v59 = vsel %vm389_vm10, %v706_v12, 0.0 }
  0x29   : > { %603 = vpow2.f32 %v333_v63  ;;  %v385_v53 = vadd.f32 %v384_v49, %v382_v46  ;;  %v399_v63 = vsel %vm398_vm13, %v718_v18, 0.0  ;;  %v420_v18 = vsel %vm262_vm0, %v419_v17, 0.0 }
  0x2a   : > { %605 = vpow2.f32 %v335_v0 }
  0x2b   : > { %607 = vpow2.f32 %v337_v13  ;;  %v388_v58 = vadd.f32 %v387_v55, %v385_v53  ;;  %v404_v13 = vld [vmem:[#allocation2] sm:$0xff] }
  0x2d   : > { %v586_v9 = vpop.eup %585  ;;  %v391_v10 = vadd.f32 %v390_v59, %v388_v58 }
  0x2e   : > { %v588_v1 = vpop.eup %587  ;;  %v339_v15 = vsel %vm262_vm0, %v586_v9, 0.0 }
  0x2f   : > { %v590_v19 = vpop.eup %589  ;;  %v340_v2 = vsel %vm262_vm0, %v588_v1, 0.0  ;;  %v394_v61 = vadd.f32 %v393_v60, %v391_v10 }
  0x30   : > { %v592_v20 = vpop.eup %591  ;;  %v341_v21 = vadd.f32 %v340_v2, %v339_v15  ;;  %v342_v22 = vsel %vm262_vm0, %v590_v19, 0.0 }
  0x31   : > { %v594_v24 = vpop.eup %593  ;;  %v344_v25 = vsel %vm262_vm0, %v592_v20, 0.0  ;;  %v397_v11 = vadd.f32 %v396_v62, %v394_v61 }
  0x32   : > { %v596_v26 = vpop.eup %595  ;;  %v343_v27 = vadd.f32 %v342_v22, %v341_v21  ;;  %v346_v28 = vsel %vm262_vm0, %v594_v24, 0.0 }
  0x33   : > { %v598_v29 = vpop.eup %597  ;;  %v348_v32 = vsel %vm262_vm0, %v596_v26, 0.0  ;;  %v400_v8 = vadd.f32 %v399_v63, %v397_v11 }
  0x34   : > { %v345_v30 = vadd.f32 %v344_v25, %v343_v27  ;;  %v600_v34 = vpop.eup %599  ;;  %v350_v37 = vsel %vm262_vm0, %v598_v29, 0.0 }
  0x35   : > { %v602_v4 = vpop.eup %601  ;;  %v352_v40 = vsel %vm262_vm0, %v600_v34, 0.0 }
  0x36   : > { %v347_v36 = vadd.f32 %v346_v28, %v345_v30  ;;  %v604_v42 = vpop.eup %603  ;;  %v354_v44 = vsel %vm262_vm0, %v602_v4, 0.0 }
  0x37   : > { %v606_v5 = vpop.eup %605  ;;  %v356_v47 = vsel %vm262_vm0, %v604_v42, 0.0 }
  0x38   : > { %v349_v38 = vadd.f32 %v348_v32, %v347_v36  ;;  %v608_v50 = vpop.eup %607  ;;  %v358_v52 = vsel %vm262_vm0, %v606_v5, 0.0 }
  0x39   : > { %v360_v54 = vsel %vm262_vm0, %v608_v50, 0.0 }
  0x3a   : > { %v351_v43 = vadd.f32 %v350_v37, %v349_v38 }
  0x3c   : > { %v353_v45 = vadd.f32 %v352_v40, %v351_v43 }
  0x3e   : > { %v355_v51 = vadd.f32 %v354_v44, %v353_v45 }
  0x40   : > { %v357_v6 = vadd.f32 %v356_v47, %v355_v51 }
  0x42   : > { %v359_v56 = vadd.f32 %v358_v52, %v357_v6 }
  0x44   : > { %v361_v57 = vadd.f32 %v360_v54, %v359_v56 }
  0x46   : > { %609 = vlog2.f32 %v361_v57 }
  0x53   : > { %v610_v7 = vpop.eup %609 }
  0x54   : > { %v363_v0 = vmul.f32 0.6931472, %v610_v7 }
  0x56   : > { %v364_v12 = vadd.f32 %v363_v0, %v733_v35 }
  0x58   : > { %v402_v9 = vsub.f32 %v364_v12, %v400_v8 }
  0x5a   : > { %v403_v16 = vsel %vm401_vm2, %v402_v9, 0.0 }
  0x5b   : > { %v405_v14 = vadd.f32 %v404_v13, %v403_v16 }
  0x5d   : > { %406 = vst.msk [vmem:[#allocation2] sm:$0xff] %vm262_vm0, %v405_v14 }
  0x64   : > { %v415_v1 = vld [vmem:[#allocation2] sm:$0xff] }
  0x65   : > { %v416_v15 = vsel %vm262_vm0, %v415_v1, 0.0 }
  0x66   : > { %417 = vadd.xlane.f32.xlu0 %v416_v15 }
  0x6a   : > { %421 = vadd.xlane.f32.xlu0 %v420_v18 }
  0xef   : > { %v418_v19 = vpop.xlane.xlu0 %417 }
  0xf0   : > { %v423_v35 = vrot.slane %v418_v19, 4 }
  0xf2   : > { %v424_v2 = vadd.f32 %v423_v35, %v418_v19 }
  0xf3   : > { %v422_v20 = vpop.xlane.xlu0 %421 }
  0xf4   : > { %v425_v21 = vrot.slane %v424_v2, 2  ;;  %v431_v48 = vrot.slane %v422_v20, 4 }
  0xf6   : > { %v426_v22 = vadd.f32 %v425_v21, %v424_v2  ;;  %v432_v23 = vadd.f32 %v431_v48, %v422_v20 }
  0xf8   : > { %v427_v24 = vrot.slane %v426_v22, 1  ;;  %v433_v25 = vrot.slane %v432_v23, 2 }
  0xfa   : > { %v428_v3 = vadd.f32 %v427_v24, %v426_v22  ;;  %v434_v26 = vadd.f32 %v433_v25, %v432_v23 }
  0xfc   : > { %430 = vst.msk [vmem:[%s251_s26] sm:$0x1] %vm429_vm14, %v428_v3  ;;  %v435_v27 = vrot.slane %v434_v26, 1 }
  0xfe   : > { %v436_v28 = vadd.f32 %v435_v27, %v434_v26 }
 0x100   : > { %437 = vst.msk [vmem:[%s256_s29] sm:$0x1] %vm429_vm14, %v436_v28 }
 0x101 PF: > { %s14_s14 = sadd.s32 1, %s633_s14   ;;  %s832_s12 = smov %s629_s13 }
 0x102   : > { %p11_p5 = scmp.ge.s32.totalorder %s14_s14, 4   ;;  %s833_s13 = smov %s835_s15 }
 0x104   :  { %13 = sbr.rel (!%p11_p5) target bundleno = 2 (0x2), region = 81 }

</bundles_post_ra>
